<compile_context>
chip_gen: v6e
topology: v6e:2x2x1
jax: 0.10.0
libtpu: 0.0.40
codegen_flags: <defaults>
</compile_context>

<pallas_src>
import functools

import jax
import jax.numpy as jnp
from jax import lax
from jax.experimental import pallas as pl
from jax.experimental.pallas import tpu as pltpu

NEG_SLOPE = 0.2  # LeakyReLU negative slope used by PMPLayer


def _dot0(a, b):
    # a:(K,M), b:(K,N) -> (M,N), contracting leading dims on the MXU (f32 acc).
    return lax.dot_general(a, b, (((0,), (0,)), ((), ())),
                           preferred_element_type=jnp.float32)


def _dot10(a, b):
    # a:(M,K), b:(K,N) -> (M,N) on the MXU (f32 acc).
    return lax.dot_general(a, b, (((1,), (0,)), ((), ())),
                           preferred_element_type=jnp.float32)


def _elu(x):
    return jnp.where(x > 0, x, jnp.exp(jnp.minimum(x, 0.0)) - 1.0)


def pmpgnn_kernel(scalars_ref,                                  # SMEM (4,) f32
                  xT_ref, latpT_ref, adj_ref, wlap_ref,         # VMEM
                  w_in_ref, w_out_ref,
                  w_s_ref, b_s_ref, w_so_ref, b_so_ref,
                  attn_l_ref, attn_r_ref, s_attn_ref,
                  out_ref, loss_ref,
                  *, k, alpha):
    gscale_f = scalars_ref[0]    # sqrt(2 * betaw * softmax(aw)[0,0])
    gscale_s = scalars_ref[1]    # sqrt(2 * betaw * softmax(aw)[0,1])
    perm_base = scalars_ref[2]   # 1e-4 / (exp(-theta) + 1)

    c = latpT_ref.shape[0]
    n = adj_ref.shape[0]
    kdim = -(-(3 * c + 2) // 8) * 8      # 8-aligned contraction depth
    pad_rows = kdim - 3 * c              # >= 2 (holds src/ones rows + zero pad)

    xT = xT_ref[...]             # (F, N)  nodes on the lane axis
    latpT = latpT_ref[...]       # (C, N)
    A = adj_ref[...]             # (N, N)  bf16 0/1, rows = src, cols = dst

    # ---- MLP head: feat = mlp_out(elu(mlp_input(x)))  (dropout = identity) ---
    hT = _elu(_dot0(w_in_ref[...], xT))                          # (H, N)
    featT = _dot0(w_out_ref[...], hT)                            # (C, N)

    # ---- structure layers on latent positions --------------------------------
    hlT = _elu(_dot0(w_s_ref[...], latpT) + b_s_ref[...])        # (C, N)
    hlatpT = _elu(_dot0(w_so_ref[...], hlT) + b_so_ref[...])     # (C, N)

    # ---- PMPLayer: fused per-edge logit (one MXU matmul) ----------------------
    feat0T = featT
    lreluT = jnp.where(feat0T > 0, feat0T, NEG_SLOPE * feat0T)
    f_gT = gscale_f * feat0T            # sqrt(2*betaw*w0) * feat
    h_gT = gscale_s * hlatpT            # sqrt(2*betaw*w1) * hlatp
    sqT = f_gT * f_gT + h_gT * h_gT     # (C, N)

    el_row = jnp.sum(lreluT * attn_l_ref[...], axis=0, keepdims=True)   # (1, N)
    er_row = jnp.sum(lreluT * attn_r_ref[...], axis=0, keepdims=True)   # (1, N)
    q_row = 0.5 * jnp.sum(sqT, axis=0, keepdims=True)                   # (1, N)
    src_row = el_row - q_row            # el[u] - betaw*(w0|f_u|^2 + w1|h_u|^2)
    dst_row = er_row - q_row            # er[v] - betaw*(w0|f_v|^2 + w1|h_v|^2)
    ones_row = jnp.ones((1, n), jnp.float32)

    # In-register operand assembly: three 8-row-aligned (C,N) blocks plus one
    # tail block built with iota/where (rank-1 rows + zero pad).  No scratch
    # refs, no full zero-fill, no masked single-row stores.
    row_ids = lax.broadcasted_iota(jnp.int32, (pad_rows, n), 0)
    lhs_tail = jnp.where(row_ids == 0, src_row,
                         jnp.where(row_ids == 1, ones_row, 0.0))
    rhs_tail = jnp.where(row_ids == 0, ones_row,
                         jnp.where(row_ids == 1, dst_row, 0.0))
    lhs = jnp.concatenate([hlatpT * s_attn_ref[...], f_gT, h_gT, lhs_tail],
                          axis=0)                                        # (kdim,N)
    rhs = jnp.concatenate([hlatpT, f_gT, h_gT, rhs_tail], axis=0)        # (kdim,N)

    # logit[u,v] = e[u,v] + se[u,v] - betaw * d[u,v]   (src on sublanes, dst on lanes)
    logit = _dot0(lhs, rhs)                                              # (N, N)

    # per-edge weight + symmetric EdgeWeightNorm (norm='both', eps=0)
    # NOTE: exp(logit) is intentionally unclamped to match the reference.
    ew = jnp.where(A > 0, jnp.exp(logit) + 1e-9, 0.0)                    # (N, N)
    deg_src = jnp.sum(ew, axis=1, keepdims=True)                         # (N, 1)
    deg_dst = jnp.sum(ew, axis=0, keepdims=True)                         # (1, N)
    norm_src = jnp.where(deg_src > 0, lax.rsqrt(deg_src), 0.0)
    norm_dst = jnp.where(deg_dst > 0, lax.rsqrt(deg_dst), 0.0)
    # Symmetric norm folded into the propagation operands: src-side norm goes
    # into the single f32->bf16 conversion (no f32 W is ever materialized, no
    # extra N^2 scaling pass / cast); dst-side norm is a (1,N) row applied to
    # each (C,N) hop result below.
    ew_bf = (ew * norm_src).astype(jnp.bfloat16)                         # (N, N) bf16

    # WL term: perm / structural in-degree
    indeg = jnp.sum(A.astype(jnp.float32), axis=0, keepdims=True) + 1e-9  # (1,N)
    permfeatT = featT * (perm_base * pl.reciprocal(indeg, approx=True))

    # k-step propagation:  h[v] <- norm_dst[v] * sum_u (norm_src[u]*ew[u,v]) * h[u]
    # bf16 MXU operands with f32 accumulation; the (1-alpha) affine, dst norm
    # and (on the last hop) the WL/perm add are one fused (C,N) VPU pass.
    om_alpha_nd = (1.0 - alpha) * norm_dst                               # (1, N)
    bias_mid = alpha * feat0T                                            # (C, N)
    bias_last = bias_mid + permfeatT                                     # (C, N)
    fpT = feat0T if k > 0 else feat0T + permfeatT
    for i in range(k):
        h_new = _dot10(fpT.astype(jnp.bfloat16), ew_bf)                  # (C, N)
        bias = bias_last if i == k - 1 else bias_mid
        fpT = h_new * om_alpha_nd + bias

    # ---- output head: elu + log_softmax over the class (sublane) axis --------
    y = _elu(fpT)
    z = y - jnp.max(y, axis=0, keepdims=True)
    lse = jnp.log(jnp.sum(jnp.exp(z), axis=0, keepdims=True))
    out_ref[...] = z - lse                                               # (C, N)

    # ---- position loss: sum_e wlap_e * <hlatp[u], hlatp[v]> -------------------
    t = _dot10(hlatpT.astype(jnp.bfloat16), wlap_ref[...])               # (C, N)
    lp = jnp.sum(t * hlatpT, axis=1, keepdims=True)                      # (C, 1)
    loss_ref[...] = jnp.sum(lp, axis=0, keepdims=True)                   # (1, 1)


def _vmem_limit_bytes():
    # ~48 MiB on v7x (64 MiB physical), ~96-100 MiB on v5e/v6e (128 MiB),
    # leaving headroom for Mosaic internal scratch and pipeline buffers.
    try:
        cap = int(pltpu.get_tpu_info().vmem_capacity_bytes)
    except Exception:
        cap = 128 * 1024 * 1024
    return int(min(100 * 1024 * 1024, (cap * 3) // 4))


def pmpgnn_forward(x, latp, adj, wlap, params, *, k, alpha):
    n, f = x.shape
    c = latp.shape[1]
    h = params['w_in'].shape[1]

    # tiny scalar parameter glue; scalar weights are folded into the kernel's
    # matmul operands so no N x N scaling passes are needed inside.
    sm = jax.nn.softmax(params['aw'], axis=1)
    betaw = 2.0 / (jnp.exp(-params['beta'][0, 0]) + 1.0)
    perm_base = 1e-4 / (jnp.exp(-params['theta'][0, 0]) + 1.0)
    gscale_f = jnp.sqrt(2.0 * betaw * sm[0, 0])
    gscale_s = jnp.sqrt(2.0 * betaw * sm[0, 1])
    scalars = jnp.stack([gscale_f, gscale_s, perm_base,
                         jnp.zeros((), jnp.float32)]).astype(jnp.float32)

    # feature tensors carried transposed (nodes on lanes); adjacency / Laplacian
    # weights narrowed to bf16 (0/1 adjacency is exact in bf16).
    xT = x.T
    latpT = latp.T
    adj_bf = adj.astype(jnp.bfloat16)
    wlap_bf = wlap.astype(jnp.bfloat16)

    smem = pl.BlockSpec(memory_space=pltpu.MemorySpace.SMEM)
    vmem = pl.BlockSpec(memory_space=pltpu.MemorySpace.VMEM)

    kdim = -(-(3 * c + 2) // 8) * 8      # contraction rows of the fused logit matmul

    flops = int(2 * n * n * kdim              # fused logit matmul
                + 2 * k * n * n * c           # k-step propagation
                + 2 * n * n * c               # position-loss matmul
                + 2 * n * f * h + 2 * n * h * c   # MLP head
                + 4 * n * c * c               # structure layers
                + 10 * n * n)                 # N^2 elementwise chain (exp/mask/cast/sums)
    transcendentals = int(n * n + 8 * n * c)
    bytes_accessed = int(4 * n * f + 4 * n * c          # x, latp
                         + 2 * (2 * n * n)              # adj, wlap (bf16)
                         + 4 * n * c + 4                # outputs
                         + 4 * (f * h + h * c + 2 * c * c + 8 * c))

    kernel = functools.partial(pmpgnn_kernel, k=k, alpha=alpha)
    outT, loss = pl.pallas_call(
        kernel,
        out_shape=(jax.ShapeDtypeStruct((c, n), jnp.float32),
                   jax.ShapeDtypeStruct((1, 1), jnp.float32)),
        in_specs=[smem] + [vmem] * 13,
        out_specs=(vmem, vmem),
        compiler_params=pltpu.CompilerParams(
            vmem_limit_bytes=_vmem_limit_bytes()),
        cost_estimate=pl.CostEstimate(flops=flops,
                                      transcendentals=transcendentals,
                                      bytes_accessed=bytes_accessed),
    )(scalars, xT, latpT, adj_bf, wlap_bf,
      params['w_in'], params['w_out'],
      params['w_s'], params['b_s'].T, params['w_so'], params['b_so'].T,
      params['attn_l'].T, params['attn_r'].T, params['s_attn'].T)
    return outT.T, loss[0, 0]


# ---------------- pure-JAX reference (numerical sanity check) -----------------
def reference_forward(x, latp, adj, wlap, p, *, k, alpha):
    def elu(v):
        return jnp.where(v > 0, v, jnp.exp(jnp.minimum(v, 0.0)) - 1.0)

    h = elu(x @ p['w_in'])
    feat = h @ p['w_out']
    hl = elu(latp @ p['w_s'] + p['b_s'])
    hlatp = elu(hl @ p['w_so'] + p['b_so'])

    feat0 = feat
    lrelu = jnp.where(feat0 > 0, feat0, NEG_SLOPE * feat0)
    el = (lrelu * p['attn_l']).sum(-1)[:, None]
    er = (lrelu * p['attn_r']).sum(-1)[None, :]
    e_mat = el + er
    se_mat = (hlatp * p['s_attn']) @ hlatp.T
    sdf = ((feat0[:, None, :] - feat0[None, :, :]) ** 2).sum(-1)
    sds = ((hlatp[:, None, :] - hlatp[None, :, :]) ** 2).sum(-1)
    w = jax.nn.softmax(p['aw'], axis=1)
    d = w[0, 0] * sdf + w[0, 1] * sds
    betaw = 2.0 / (jnp.exp(-p['beta'][0, 0]) + 1.0)
    logit = e_mat + se_mat - betaw * d
    ew = adj * (jnp.exp(jnp.where(adj > 0, logit, 0.0)) + 1e-9)
    deg_src = ew.sum(1)[:, None]
    deg_dst = ew.sum(0)[None, :]
    W = ew * (deg_src ** -0.5) * (deg_dst ** -0.5)
    indeg = adj.sum(0)[:, None] + 1e-9
    perm_base = 1e-4 / (jnp.exp(-p['theta'][0, 0]) + 1.0)
    permfeat = feat * (perm_base / indeg)
    fp = feat
    for _ in range(k):
        fp = (1.0 - alpha) * (W.T @ fp) + alpha * feat0
    fp = fp + permfeat
    out = jax.nn.log_softmax(elu(fp), axis=1)
    lp_loss = jnp.sum(wlap * (hlatp @ hlatp.T))
    return out, lp_loss


def init_params(key, n, f, h, c):
    keys = jax.random.split(key, 11)

    def xn(kk, shape, gain=1.414):
        fan_in, fan_out = shape[0], shape[1]
        std = gain * (2.0 / (fan_in + fan_out)) ** 0.5
        return std * jax.random.normal(kk, shape, jnp.float32)

    p = {}
    p['latp'] = xn(keys[0], (n, c))                 # nn.Parameter (nsample, nclass)
    p['w_in'] = xn(keys[1], (f, h), gain=1.0)       # mlp_input (pre-transposed)
    p['w_out'] = xn(keys[2], (h, c), gain=1.0)      # mlp_out   (pre-transposed)
    p['w_s'] = xn(keys[3], (c, c), gain=1.0)        # structure_layer
    p['b_s'] = jnp.zeros((1, c), jnp.float32)
    p['w_so'] = xn(keys[4], (c, c), gain=1.0)       # structure_layer_out
    p['b_so'] = jnp.zeros((1, c), jnp.float32)
    p['attn_l'] = xn(keys[5], (1, c))
    p['attn_r'] = xn(keys[6], (1, c))
    p['s_attn'] = xn(keys[7], (1, c))
    p['beta'] = xn(keys[8], (1, 1))
    p['theta'] = xn(keys[9], (1, 1))
    p['aw'] = xn(keys[10], (1, 2))
    return p


if __name__ == "__main__":
    N, F, H, C = 64, 32, 32, 8          # nsample, nfeat, nhid, nclass
    K_HOPS, ALPHA = 3, 0.1

    key = jax.random.PRNGKey(0)
    k_adj, k_w, k_x, k_p = jax.random.split(key, 4)

    # small random directed graph with self-loops (dense adjacency [src, dst])
    adj = (jax.random.uniform(k_adj, (N, N)) < 0.15).astype(jnp.float32)
    adj = jnp.maximum(adj, jnp.eye(N, dtype=jnp.float32))
    wlap = adj * jax.random.uniform(k_w, (N, N), minval=0.1, maxval=1.0)
    x = jax.random.normal(k_x, (N, F), jnp.float32)
    params = init_params(k_p, N, F, H, C)

    out, loss = pmpgnn_forward(x, params['latp'], adj, wlap, params,
                               k=K_HOPS, alpha=ALPHA)
    out = jax.block_until_ready(out)
    loss = jax.block_until_ready(loss)

    ref_out, ref_loss = reference_forward(x, params['latp'], adj, wlap, params,
                                          k=K_HOPS, alpha=ALPHA)
    # tolerance accounts for bf16 MXU operands (f32 accumulate) and bf16 adj/wlap
    assert jnp.allclose(out, ref_out, atol=3e-2, rtol=3e-2), "output mismatch"
    assert jnp.allclose(loss, ref_loss, atol=3e-2, rtol=3e-2), "loss mismatch"
    print("KERNEL_OK")
</pallas_src>

<mosaic_0001>
module attributes {stable_mosaic.version = 11 : i64} {
  func.func @pmpgnn_kernel(%arg0: memref<4xf32, #tpu.memory_space<smem>>, %arg1: memref<32x64xf32, #tpu.memory_space<vmem>>, %arg2: memref<8x64xf32, #tpu.memory_space<vmem>>, %arg3: memref<64x64xbf16, #tpu.memory_space<vmem>>, %arg4: memref<64x64xbf16, #tpu.memory_space<vmem>>, %arg5: memref<32x32xf32, #tpu.memory_space<vmem>>, %arg6: memref<32x8xf32, #tpu.memory_space<vmem>>, %arg7: memref<8x8xf32, #tpu.memory_space<vmem>>, %arg8: memref<8x1xf32, #tpu.memory_space<vmem>>, %arg9: memref<8x8xf32, #tpu.memory_space<vmem>>, %arg10: memref<8x1xf32, #tpu.memory_space<vmem>>, %arg11: memref<8x1xf32, #tpu.memory_space<vmem>>, %arg12: memref<8x1xf32, #tpu.memory_space<vmem>>, %arg13: memref<8x1xf32, #tpu.memory_space<vmem>>, %arg14: memref<8x64xf32, #tpu.memory_space<vmem>>, %arg15: memref<1x1xf32, #tpu.memory_space<vmem>>) attributes {dimension_semantics = [], scalar_prefetch = 0 : i64, scratch_operands = 0 : i64, tpu.core_type = #tpu.core_type<tc>} {
    %c0 = arith.constant 0 : index
    %0 = memref.load %arg0[%c0] : memref<4xf32, #tpu.memory_space<smem>>
    %c1 = arith.constant 1 : index
    %1 = memref.load %arg0[%c1] : memref<4xf32, #tpu.memory_space<smem>>
    %c2 = arith.constant 2 : index
    %2 = memref.load %arg0[%c2] : memref<4xf32, #tpu.memory_space<smem>>
    %c0_0 = arith.constant 0 : index
    %c0_1 = arith.constant 0 : index
    %3 = vector.load %arg1[%c0_0, %c0_1] : memref<32x64xf32, #tpu.memory_space<vmem>>, vector<32x64xf32>
    %c0_2 = arith.constant 0 : index
    %c0_3 = arith.constant 0 : index
    %4 = vector.load %arg2[%c0_2, %c0_3] : memref<8x64xf32, #tpu.memory_space<vmem>>, vector<8x64xf32>
    %c0_4 = arith.constant 0 : index
    %c0_5 = arith.constant 0 : index
    %5 = vector.load %arg3[%c0_4, %c0_5] : memref<64x64xbf16, #tpu.memory_space<vmem>>, vector<64x64xbf16>
    %c0_6 = arith.constant 0 : index
    %c0_7 = arith.constant 0 : index
    %6 = vector.load %arg5[%c0_6, %c0_7] : memref<32x32xf32, #tpu.memory_space<vmem>>, vector<32x32xf32>
    %cst = arith.constant dense<0.000000e+00> : vector<32x64xf32>
    %7 = tpu.matmul %6, %3, %cst {dimension_numbers = #tpu.dot_dimension_numbers<[0], [0], [1], [1], [0, 1, 1, 1], [], []>} : vector<32x32xf32>, vector<32x64xf32>, vector<32x64xf32> -> vector<32x64xf32>
    %cst_8 = arith.constant 0.000000e+00 : f32
    %8 = vector.broadcast %cst_8 : f32 to vector<32x64xf32>
    %9 = arith.cmpf ogt, %7, %8 : vector<32x64xf32>
    %cst_9 = arith.constant 0.000000e+00 : f32
    %10 = vector.broadcast %cst_9 : f32 to vector<32x64xf32>
    %11 = arith.minimumf %7, %10 : vector<32x64xf32>
    %12 = math.exp %11 : vector<32x64xf32>
    %cst_10 = arith.constant 1.000000e+00 : f32
    %13 = vector.broadcast %cst_10 : f32 to vector<32x64xf32>
    %14 = arith.subf %12, %13 : vector<32x64xf32>
    %15 = arith.select %9, %7, %14 : vector<32x64xi1>, vector<32x64xf32>
    %c0_11 = arith.constant 0 : index
    %c0_12 = arith.constant 0 : index
    %16 = vector.load %arg6[%c0_11, %c0_12] : memref<32x8xf32, #tpu.memory_space<vmem>>, vector<32x8xf32>
    %cst_13 = arith.constant dense<0.000000e+00> : vector<8x64xf32>
    %17 = tpu.matmul %16, %15, %cst_13 {dimension_numbers = #tpu.dot_dimension_numbers<[0], [0], [1], [1], [0, 1, 1, 1], [], []>} : vector<32x8xf32>, vector<32x64xf32>, vector<8x64xf32> -> vector<8x64xf32>
    %c0_14 = arith.constant 0 : index
    %c0_15 = arith.constant 0 : index
    %18 = vector.load %arg7[%c0_14, %c0_15] : memref<8x8xf32, #tpu.memory_space<vmem>>, vector<8x8xf32>
    %cst_16 = arith.constant dense<0.000000e+00> : vector<8x64xf32>
    %19 = tpu.matmul %18, %4, %cst_16 {dimension_numbers = #tpu.dot_dimension_numbers<[0], [0], [1], [1], [0, 1, 1, 1], [], []>} : vector<8x8xf32>, vector<8x64xf32>, vector<8x64xf32> -> vector<8x64xf32>
    %c0_17 = arith.constant 0 : index
    %c0_18 = arith.constant 0 : index
    %20 = vector.load %arg8[%c0_17, %c0_18] : memref<8x1xf32, #tpu.memory_space<vmem>>, vector<8x1xf32>
    %21 = vector.broadcast %20 : vector<8x1xf32> to vector<8x64xf32>
    %22 = arith.addf %19, %21 : vector<8x64xf32>
    %cst_19 = arith.constant 0.000000e+00 : f32
    %23 = vector.broadcast %cst_19 : f32 to vector<8x64xf32>
    %24 = arith.cmpf ogt, %22, %23 : vector<8x64xf32>
    %cst_20 = arith.constant 0.000000e+00 : f32
    %25 = vector.broadcast %cst_20 : f32 to vector<8x64xf32>
    %26 = arith.minimumf %22, %25 : vector<8x64xf32>
    %27 = math.exp %26 : vector<8x64xf32>
    %cst_21 = arith.constant 1.000000e+00 : f32
    %28 = vector.broadcast %cst_21 : f32 to vector<8x64xf32>
    %29 = arith.subf %27, %28 : vector<8x64xf32>
    %30 = arith.select %24, %22, %29 : vector<8x64xi1>, vector<8x64xf32>
    %c0_22 = arith.constant 0 : index
    %c0_23 = arith.constant 0 : index
    %31 = vector.load %arg9[%c0_22, %c0_23] : memref<8x8xf32, #tpu.memory_space<vmem>>, vector<8x8xf32>
    %cst_24 = arith.constant dense<0.000000e+00> : vector<8x64xf32>
    %32 = tpu.matmul %31, %30, %cst_24 {dimension_numbers = #tpu.dot_dimension_numbers<[0], [0], [1], [1], [0, 1, 1, 1], [], []>} : vector<8x8xf32>, vector<8x64xf32>, vector<8x64xf32> -> vector<8x64xf32>
    %c0_25 = arith.constant 0 : index
    %c0_26 = arith.constant 0 : index
    %33 = vector.load %arg10[%c0_25, %c0_26] : memref<8x1xf32, #tpu.memory_space<vmem>>, vector<8x1xf32>
    %34 = vector.broadcast %33 : vector<8x1xf32> to vector<8x64xf32>
    %35 = arith.addf %32, %34 : vector<8x64xf32>
    %cst_27 = arith.constant 0.000000e+00 : f32
    %36 = vector.broadcast %cst_27 : f32 to vector<8x64xf32>
    %37 = arith.cmpf ogt, %35, %36 : vector<8x64xf32>
    %cst_28 = arith.constant 0.000000e+00 : f32
    %38 = vector.broadcast %cst_28 : f32 to vector<8x64xf32>
    %39 = arith.minimumf %35, %38 : vector<8x64xf32>
    %40 = math.exp %39 : vector<8x64xf32>
    %cst_29 = arith.constant 1.000000e+00 : f32
    %41 = vector.broadcast %cst_29 : f32 to vector<8x64xf32>
    %42 = arith.subf %40, %41 : vector<8x64xf32>
    %43 = arith.select %37, %35, %42 : vector<8x64xi1>, vector<8x64xf32>
    %cst_30 = arith.constant 0.000000e+00 : f32
    %44 = vector.broadcast %cst_30 : f32 to vector<8x64xf32>
    %45 = arith.cmpf ogt, %17, %44 : vector<8x64xf32>
    %cst_31 = arith.constant 2.000000e-01 : f32
    %46 = vector.broadcast %cst_31 : f32 to vector<8x64xf32>
    %47 = arith.mulf %46, %17 : vector<8x64xf32>
    %48 = arith.select %45, %17, %47 : vector<8x64xi1>, vector<8x64xf32>
    %49 = vector.broadcast %0 : f32 to vector<8x64xf32>
    %50 = arith.mulf %49, %17 : vector<8x64xf32>
    %51 = vector.broadcast %1 : f32 to vector<8x64xf32>
    %52 = arith.mulf %51, %43 : vector<8x64xf32>
    %53 = arith.mulf %50, %50 : vector<8x64xf32>
    %54 = arith.mulf %52, %52 : vector<8x64xf32>
    %55 = arith.addf %53, %54 : vector<8x64xf32>
    %c0_32 = arith.constant 0 : index
    %c0_33 = arith.constant 0 : index
    %56 = vector.load %arg11[%c0_32, %c0_33] : memref<8x1xf32, #tpu.memory_space<vmem>>, vector<8x1xf32>
    %57 = vector.broadcast %56 : vector<8x1xf32> to vector<8x64xf32>
    %58 = arith.mulf %48, %57 : vector<8x64xf32>
    %cst_34 = arith.constant dense<0.000000e+00> : vector<64xf32>
    %59 = vector.multi_reduction <add>, %58, %cst_34 [0] : vector<8x64xf32> to vector<64xf32>
    %60 = vector.shape_cast %59 : vector<64xf32> to vector<1x64xf32>
    %c0_35 = arith.constant 0 : index
    %c0_36 = arith.constant 0 : index
    %61 = vector.load %arg12[%c0_35, %c0_36] : memref<8x1xf32, #tpu.memory_space<vmem>>, vector<8x1xf32>
    %62 = vector.broadcast %61 : vector<8x1xf32> to vector<8x64xf32>
    %63 = arith.mulf %48, %62 : vector<8x64xf32>
    %cst_37 = arith.constant dense<0.000000e+00> : vector<64xf32>
    %64 = vector.multi_reduction <add>, %63, %cst_37 [0] : vector<8x64xf32> to vector<64xf32>
    %65 = vector.shape_cast %64 : vector<64xf32> to vector<1x64xf32>
    %cst_38 = arith.constant dense<0.000000e+00> : vector<64xf32>
    %66 = vector.multi_reduction <add>, %55, %cst_38 [0] : vector<8x64xf32> to vector<64xf32>
    %67 = vector.shape_cast %66 : vector<64xf32> to vector<1x64xf32>
    %cst_39 = arith.constant 5.000000e-01 : f32
    %68 = vector.broadcast %cst_39 : f32 to vector<1x64xf32>
    %69 = arith.mulf %68, %67 : vector<1x64xf32>
    %70 = arith.subf %60, %69 : vector<1x64xf32>
    %71 = arith.subf %65, %69 : vector<1x64xf32>
    %cst_40 = arith.constant 1.000000e+00 : f32
    %72 = vector.broadcast %cst_40 : f32 to vector<1x64xf32>
    %73 = tpu.iota {dimensions = array<i32: 0>} : vector<8x64xi32>
    %c0_i32 = arith.constant 0 : i32
    %74 = vector.broadcast %c0_i32 : i32 to vector<8x64xi32>
    %75 = arith.cmpi eq, %73, %74 : vector<8x64xi32>
    %c1_i32 = arith.constant 1 : i32
    %76 = vector.broadcast %c1_i32 : i32 to vector<8x64xi32>
    %77 = arith.cmpi eq, %73, %76 : vector<8x64xi32>
    %cst_41 = arith.constant 0.000000e+00 : f32
    %78 = vector.shape_cast %72 : vector<1x64xf32> to vector<1x64xf32>
    %79 = vector.broadcast %78 : vector<1x64xf32> to vector<8x64xf32>
    %80 = vector.broadcast %cst_41 : f32 to vector<8x64xf32>
    %81 = arith.select %77, %79, %80 : vector<8x64xi1>, vector<8x64xf32>
    %82 = vector.shape_cast %70 : vector<1x64xf32> to vector<1x64xf32>
    %83 = vector.broadcast %82 : vector<1x64xf32> to vector<8x64xf32>
    %84 = arith.select %75, %83, %81 : vector<8x64xi1>, vector<8x64xf32>
    %c0_i32_42 = arith.constant 0 : i32
    %85 = vector.broadcast %c0_i32_42 : i32 to vector<8x64xi32>
    %86 = arith.cmpi eq, %73, %85 : vector<8x64xi32>
    %c1_i32_43 = arith.constant 1 : i32
    %87 = vector.broadcast %c1_i32_43 : i32 to vector<8x64xi32>
    %88 = arith.cmpi eq, %73, %87 : vector<8x64xi32>
    %cst_44 = arith.constant 0.000000e+00 : f32
    %89 = vector.shape_cast %71 : vector<1x64xf32> to vector<1x64xf32>
    %90 = vector.broadcast %89 : vector<1x64xf32> to vector<8x64xf32>
    %91 = vector.broadcast %cst_44 : f32 to vector<8x64xf32>
    %92 = arith.select %88, %90, %91 : vector<8x64xi1>, vector<8x64xf32>
    %93 = vector.shape_cast %72 : vector<1x64xf32> to vector<1x64xf32>
    %94 = vector.broadcast %93 : vector<1x64xf32> to vector<8x64xf32>
    %95 = arith.select %86, %94, %92 : vector<8x64xi1>, vector<8x64xf32>
    %c0_45 = arith.constant 0 : index
    %c0_46 = arith.constant 0 : index
    %96 = vector.load %arg13[%c0_45, %c0_46] : memref<8x1xf32, #tpu.memory_space<vmem>>, vector<8x1xf32>
    %97 = vector.broadcast %96 : vector<8x1xf32> to vector<8x64xf32>
    %98 = arith.mulf %43, %97 : vector<8x64xf32>
    %99 = tpu.concatenate %98, %50, %52, %84 in 0 : vector<8x64xf32>, vector<8x64xf32>, vector<8x64xf32>, vector<8x64xf32> -> vector<32x64xf32>
    %100 = tpu.concatenate %43, %50, %52, %95 in 0 : vector<8x64xf32>, vector<8x64xf32>, vector<8x64xf32>, vector<8x64xf32> -> vector<32x64xf32>
    %cst_47 = arith.constant dense<0.000000e+00> : vector<64x64xf32>
    %101 = tpu.matmul %99, %100, %cst_47 {dimension_numbers = #tpu.dot_dimension_numbers<[0], [0], [1], [1], [0, 1, 1, 1], [], []>} : vector<32x64xf32>, vector<32x64xf32>, vector<64x64xf32> -> vector<64x64xf32>
    %cst_48 = arith.constant 0.000000e+00 : bf16
    %102 = vector.broadcast %cst_48 : bf16 to vector<64x64xbf16>
    %103 = arith.cmpf ogt, %5, %102 : vector<64x64xbf16>
    %104 = math.exp %101 : vector<64x64xf32>
    %cst_49 = arith.constant 9.99999971E-10 : f32
    %105 = vector.broadcast %cst_49 : f32 to vector<64x64xf32>
    %106 = arith.addf %104, %105 : vector<64x64xf32>
    %cst_50 = arith.constant 0.000000e+00 : f32
    %107 = vector.broadcast %cst_50 : f32 to vector<64x64xf32>
    %108 = arith.select %103, %106, %107 : vector<64x64xi1>, vector<64x64xf32>
    %cst_51 = arith.constant dense<0.000000e+00> : vector<64xf32>
    %109 = vector.multi_reduction <add>, %108, %cst_51 [1] : vector<64x64xf32> to vector<64xf32>
    %110 = vector.shape_cast %109 : vector<64xf32> to vector<64x1xf32>
    %cst_52 = arith.constant dense<0.000000e+00> : vector<64xf32>
    %111 = vector.multi_reduction <add>, %108, %cst_52 [0] : vector<64x64xf32> to vector<64xf32>
    %112 = vector.shape_cast %111 : vector<64xf32> to vector<1x64xf32>
    %cst_53 = arith.constant 0.000000e+00 : f32
    %113 = vector.broadcast %cst_53 : f32 to vector<64x1xf32>
    %114 = arith.cmpf ogt, %110, %113 : vector<64x1xf32>
    %115 = math.rsqrt %110 : vector<64x1xf32>
    %cst_54 = arith.constant 0.000000e+00 : f32
    %116 = vector.broadcast %cst_54 : f32 to vector<64x1xf32>
    %117 = arith.select %114, %115, %116 : vector<64x1xi1>, vector<64x1xf32>
    %cst_55 = arith.constant 0.000000e+00 : f32
    %118 = vector.broadcast %cst_55 : f32 to vector<1x64xf32>
    %119 = arith.cmpf ogt, %112, %118 : vector<1x64xf32>
    %120 = math.rsqrt %112 : vector<1x64xf32>
    %cst_56 = arith.constant 0.000000e+00 : f32
    %121 = vector.broadcast %cst_56 : f32 to vector<1x64xf32>
    %122 = arith.select %119, %120, %121 : vector<1x64xi1>, vector<1x64xf32>
    %123 = vector.broadcast %117 : vector<64x1xf32> to vector<64x64xf32>
    %124 = arith.mulf %108, %123 : vector<64x64xf32>
    %125 = arith.truncf %124 : vector<64x64xf32> to vector<64x64xbf16>
    %126 = arith.extf %5 : vector<64x64xbf16> to vector<64x64xf32>
    %cst_57 = arith.constant dense<0.000000e+00> : vector<64xf32>
    %127 = vector.multi_reduction <add>, %126, %cst_57 [0] : vector<64x64xf32> to vector<64xf32>
    %128 = vector.shape_cast %127 : vector<64xf32> to vector<1x64xf32>
    %cst_58 = arith.constant 9.99999971E-10 : f32
    %129 = vector.broadcast %cst_58 : f32 to vector<1x64xf32>
    %130 = arith.addf %128, %129 : vector<1x64xf32>
    %131 = tpu.reciprocal %130 {approx = true} : vector<1x64xf32> -> vector<1x64xf32>
    %132 = vector.broadcast %2 : f32 to vector<1x64xf32>
    %133 = arith.mulf %132, %131 : vector<1x64xf32>
    %134 = vector.broadcast %133 : vector<1x64xf32> to vector<8x64xf32>
    %135 = arith.mulf %17, %134 : vector<8x64xf32>
    %cst_59 = arith.constant 0.899999976 : f32
    %136 = vector.broadcast %cst_59 : f32 to vector<1x64xf32>
    %137 = arith.mulf %136, %122 : vector<1x64xf32>
    %cst_60 = arith.constant 1.000000e-01 : f32
    %138 = vector.broadcast %cst_60 : f32 to vector<8x64xf32>
    %139 = arith.mulf %138, %17 : vector<8x64xf32>
    %140 = arith.addf %139, %135 : vector<8x64xf32>
    %141 = arith.truncf %17 : vector<8x64xf32> to vector<8x64xbf16>
    %cst_61 = arith.constant dense<0.000000e+00> : vector<8x64xf32>
    %142 = tpu.matmul %141, %125, %cst_61 {dimension_numbers = #tpu.dot_dimension_numbers<[1], [0], [0], [1], [0, 0, 1, 1], [], []>} : vector<8x64xbf16>, vector<64x64xbf16>, vector<8x64xf32> -> vector<8x64xf32>
    %143 = vector.broadcast %137 : vector<1x64xf32> to vector<8x64xf32>
    %144 = arith.mulf %142, %143 : vector<8x64xf32>
    %145 = arith.addf %144, %139 : vector<8x64xf32>
    %146 = arith.truncf %145 : vector<8x64xf32> to vector<8x64xbf16>
    %cst_62 = arith.constant dense<0.000000e+00> : vector<8x64xf32>
    %147 = tpu.matmul %146, %125, %cst_62 {dimension_numbers = #tpu.dot_dimension_numbers<[1], [0], [0], [1], [0, 0, 1, 1], [], []>} : vector<8x64xbf16>, vector<64x64xbf16>, vector<8x64xf32> -> vector<8x64xf32>
    %148 = vector.broadcast %137 : vector<1x64xf32> to vector<8x64xf32>
    %149 = arith.mulf %147, %148 : vector<8x64xf32>
    %150 = arith.addf %149, %139 : vector<8x64xf32>
    %151 = arith.truncf %150 : vector<8x64xf32> to vector<8x64xbf16>
    %cst_63 = arith.constant dense<0.000000e+00> : vector<8x64xf32>
    %152 = tpu.matmul %151, %125, %cst_63 {dimension_numbers = #tpu.dot_dimension_numbers<[1], [0], [0], [1], [0, 0, 1, 1], [], []>} : vector<8x64xbf16>, vector<64x64xbf16>, vector<8x64xf32> -> vector<8x64xf32>
    %153 = vector.broadcast %137 : vector<1x64xf32> to vector<8x64xf32>
    %154 = arith.mulf %152, %153 : vector<8x64xf32>
    %155 = arith.addf %154, %140 : vector<8x64xf32>
    %cst_64 = arith.constant 0.000000e+00 : f32
    %156 = vector.broadcast %cst_64 : f32 to vector<8x64xf32>
    %157 = arith.cmpf ogt, %155, %156 : vector<8x64xf32>
    %cst_65 = arith.constant 0.000000e+00 : f32
    %158 = vector.broadcast %cst_65 : f32 to vector<8x64xf32>
    %159 = arith.minimumf %155, %158 : vector<8x64xf32>
    %160 = math.exp %159 : vector<8x64xf32>
    %cst_66 = arith.constant 1.000000e+00 : f32
    %161 = vector.broadcast %cst_66 : f32 to vector<8x64xf32>
    %162 = arith.subf %160, %161 : vector<8x64xf32>
    %163 = arith.select %157, %155, %162 : vector<8x64xi1>, vector<8x64xf32>
    %cst_67 = arith.constant dense<0xFF800000> : vector<64xf32>
    %164 = vector.multi_reduction <maximumf>, %163, %cst_67 [0] : vector<8x64xf32> to vector<64xf32>
    %165 = vector.shape_cast %164 : vector<64xf32> to vector<1x64xf32>
    %166 = vector.broadcast %165 : vector<1x64xf32> to vector<8x64xf32>
    %167 = arith.subf %163, %166 : vector<8x64xf32>
    %168 = math.exp %167 : vector<8x64xf32>
    %cst_68 = arith.constant dense<0.000000e+00> : vector<64xf32>
    %169 = vector.multi_reduction <add>, %168, %cst_68 [0] : vector<8x64xf32> to vector<64xf32>
    %170 = vector.shape_cast %169 : vector<64xf32> to vector<1x64xf32>
    %171 = math.log %170 : vector<1x64xf32>
    %172 = vector.broadcast %171 : vector<1x64xf32> to vector<8x64xf32>
    %173 = arith.subf %167, %172 : vector<8x64xf32>
    %c0_69 = arith.constant 0 : index
    %c0_70 = arith.constant 0 : index
    %174 = vector.load %arg14[%c0_69, %c0_70] : memref<8x64xf32, #tpu.memory_space<vmem>>, vector<8x64xf32>
    tpu.vector_store %arg14[%c0_69, %c0_70], %173 {strides = array<i32>} : memref<8x64xf32, #tpu.memory_space<vmem>>, vector<8x64xf32>,
    %175 = arith.truncf %43 : vector<8x64xf32> to vector<8x64xbf16>
    %c0_71 = arith.constant 0 : index
    %c0_72 = arith.constant 0 : index
    %176 = vector.load %arg4[%c0_71, %c0_72] : memref<64x64xbf16, #tpu.memory_space<vmem>>, vector<64x64xbf16>
    %cst_73 = arith.constant dense<0.000000e+00> : vector<8x64xf32>
    %177 = tpu.matmul %175, %176, %cst_73 {dimension_numbers = #tpu.dot_dimension_numbers<[1], [0], [0], [1], [0, 0, 1, 1], [], []>} : vector<8x64xbf16>, vector<64x64xbf16>, vector<8x64xf32> -> vector<8x64xf32>
    %178 = arith.mulf %177, %43 : vector<8x64xf32>
    %cst_74 = arith.constant dense<0.000000e+00> : vector<8xf32>
    %179 = vector.multi_reduction <add>, %178, %cst_74 [1] : vector<8x64xf32> to vector<8xf32>
    %180 = vector.shape_cast %179 : vector<8xf32> to vector<8x1xf32>
    %cst_75 = arith.constant dense<0.000000e+00> : vector<1xf32>
    %181 = vector.multi_reduction <add>, %180, %cst_75 [0] : vector<8x1xf32> to vector<1xf32>
    %182 = vector.shape_cast %181 : vector<1xf32> to vector<1x1xf32>
    %c0_76 = arith.constant 0 : index
    %c0_77 = arith.constant 0 : index
    %183 = vector.load %arg15[%c0_76, %c0_77] : memref<1x1xf32, #tpu.memory_space<vmem>>, vector<1x1xf32>
    tpu.vector_store %arg15[%c0_76, %c0_77], %182 {strides = array<i32>} : memref<1x1xf32, #tpu.memory_space<vmem>>, vector<1x1xf32>,
    return
  }
}

</mosaic_0001>

<bundles_post_ra>
// kernel: tpu_custom_call.1
= control target key start
LH: loop header
LB: loop body
LE: loop exit
PB: predicated region body
PF: predicated region fallthrough
CT: control target
= control target key end

     0   :  { %21 = vsyncpa [#allocation5], 0  ;;  %s2014_s0 = inlined_call_operand.hbm [shape: f32[4], index: 0, kind: input, shape index: {}]   ;;  %s2015_s1 = inlined_call_operand.vmem [shape: f32[32,64], index: 1, kind: input, shape index: {}]   ;;  %s2016_s2 = inlined_call_operand.vmem [shape: f32[8,64], index: 2, kind: input, shape index: {}]   ;;  %s2017_s3 = inlined_call_operand.vmem [shape: bf16[64,64], index: 3, kind: input, shape index: {}]   ;;  %s2018_s4 = inlined_call_operand.hbm [shape: bf16[64,64], index: 4, kind: input, shape index: {}]   ;;  %s2019_s5 = inlined_call_operand.hbm [shape: f32[32,32], index: 5, kind: input, shape index: {}]   ;;  %s2020_s6 = inlined_call_operand.vmem [shape: f32[32,8], index: 6, kind: input, shape index: {}]   ;;  %s2021_s7 = inlined_call_operand.vmem [shape: f32[8,8], index: 7, kind: input, shape index: {}]   ;;  %s2022_s8 = inlined_call_operand.vmem [shape: f32[8,1], index: 8, kind: input, shape index: {}]   ;;  %s2023_s9 = inlined_call_operand.vmem [shape: f32[8,8], index: 9, kind: input, shape index: {}]   ;;  %s2024_s10 = inlined_call_operand.vmem [shape: f32[8,1], index: 10, kind: input, shape index: {}]   ;;  %s2025_s11 = inlined_call_operand.vmem [shape: f32[8,1], index: 11, kind: input, shape index: {}]   ;;  %s2026_s12 = inlined_call_operand.vmem [shape: f32[8,1], index: 12, kind: input, shape index: {}]   ;;  %s2027_s13 = inlined_call_operand.vmem [shape: f32[8,1], index: 13, kind: input, shape index: {}]   ;;  %s2028_s14 = inlined_call_operand.hbm [shape: f32[8,64], index: 14, kind: output, shape index: {0}]   ;;  %s2029_s15 = inlined_call_operand.hbm [shape: f32[1,1], index: 15, kind: output, shape index: {1}]  }
   0x1   :  { %22 = vsyncpa [#allocation3], 0 }
   0x2   :  { %23 = vsyncpa [#allocation8], 0 }
   0x3   :  { %24 = vsyncpa [#allocation4], 0 }
   0x4   :  { %25 = vsyncpa [#allocation11], 0  ;;  %s1653_s18 = smov [#allocation2]   ;;  %s1654_s21 = smov [#allocation6]  }
   0x5   :  { %33 = dma.hbm_to_smem %s2014_s0, 16, %s1653_s18, [#allocation5]  }
   0x6   :  { %s45_s22 = sshll.u32 %s1654_s21, 4  ;;  %s46_s22 = int_to_ptr.vmem [resolvable:$true] %s45_s22 }
   0x7   :  { %s1571_s23 = scalar_lea.vmem %s46_s22, 512  ;;  %p1576_p1 = scmp.lt.s32.totalorder %s46_s22, %s46_s22 }
   0x8   :  { %p1572_p0 = scmp.ne.s32.totalorder %s46_s22, %s1571_s23  ;;  %p1577_p2 = scmp.lt.s32.totalorder %s1571_s23, %s1571_s23 }
   0xa   :  { %p1578_p3 = por %p1577_p2, %p1576_p1 }
   0xc   :  { %p1579_p4 = pnand %p1578_p3, %p1572_p0 }
   0xe   :  { %1582 = shalt.err (!%p1579_p4)
}
   0xf   :  { %s1655_s24 = smov 64   ;;  %s1656_s25 = smov 4  }
  0x10   :  { %51 = dma.hbm_to_vmem [thread:$0]  %s2018_s4, 512, %s46_s22, [#allocation3], %s1655_s24, %s1655_s24, %s1656_s25  }
  0x11   :  { %s1657_s28 = smov [#allocation7]  }
  0x12   :  { %s57_s29 = sshll.u32 %s1657_s28, 4  ;;  %s58_s29 = int_to_ptr.vmem [resolvable:$true] %s57_s29 }
  0x13   :  { %s1591_s0 = scalar_lea.vmem %s58_s29, 512  ;;  %p1596_p6 = scmp.lt.s32.totalorder %s58_s29, %s58_s29 }
  0x14   :  { %p1592_p5 = scmp.ne.s32.totalorder %s58_s29, %s1591_s0  ;;  %p1597_p7 = scmp.lt.s32.totalorder %s1591_s0, %s1591_s0 }
  0x16   :  { %p1598_p8 = por %p1597_p7, %p1596_p6 }
  0x18   :  { %p1599_p9 = pnand %p1598_p8, %p1592_p5 }
  0x1a   :  { %1602 = shalt.err (!%p1599_p9)
}
  0x1b   :  { %s1658_s30 = smov 128   ;;  %s1659_s16 = smov 8  }
  0x1c   :  { %63 = dma.hbm_to_vmem [thread:$0]  %s2019_s5, 512, %s58_s29, [#allocation8], %s1658_s30, %s1658_s30, %s1659_s16  }
  0x1d   :  { %1643 = dma.done.wait [#allocation5], 16  }
  0x1e   :  { %1644 = vsyncadd [#allocation5], 4294967280 }
  0x1f   :  { %1645 = dma.done.wait [#allocation3], 512  }
  0x20   :  { %1646 = vsyncadd [#allocation3], 4294966784 }
  0x21   :  { %1647 = dma.done.wait [#allocation8], 512  }
  0x22   :  { %1648 = vsyncadd [#allocation8], 4294966784 }
  0x23   :  { %89 = sfence }
  0x24   :  { %v109_v0 = vld [vmem:[#allocation7] sm:$0xff]  ;;  %v99_v1 = vld [vmem:[%s2015_s1 + $0x18] sm:$0xff]  ;;  %v98_v2 = vld [vmem:[%s2015_s1 + $0x10] sm:$0xff]  ;;  %vm145_vm0 = vcmask 261120   ;;  %v1660_v17 = vmov 0.0   ;;  %vm1661_vm1 = vmmov 0  }
  0x25   :  { %113 = vxpose.xlu0.b32.start [1/4] (short) (narrow) %v109_v0, 32  ;;  %v110_v3 = vld [vmem:[#allocation7 + $0x8] sm:$0xff]  ;;  %1380 = vmatprep.subr.mxu0 %v99_v1  ;;  %v96_v5 = vld [vmem:[%s2015_s1] sm:$0xff]  ;;  %v111_v6 = vld [vmem:[#allocation7 + $0x10] sm:$0xff]  ;;  %v1662_v19 = vmov 0   ;;  %vm415_vm6 = vcmask 64512  }
  0x26   :  { %v97_v4 = vld [vmem:[%s2015_s1 + $0x8] sm:$0xff]  ;;  %1381 = vmatpush3.msra.mxu0 %v99_v1  ;;  %v112_v7 = vld [vmem:[#allocation7 + $0x18] sm:$0xff]  ;;  %v267_v8 = vld [vmem:[%s2020_s6] sm:$0xff]  ;;  %1394 = vmatprep.subr.mxu1 %v1660_v17  ;;  %vm630_vm9 = vcmask 523264  }
  0x27   :  { %1382 = vmatprep.subr.mxu0 %v98_v2  ;;  %271 = vxpose.xlu1.b32.start [1/4] (short) (narrow) %v267_v8, 8  ;;  %v268_v9 = vld [vmem:[%s2020_s6 + $0x8] sm:$0xff]  ;;  %v376_v10 = vld [vmem:[%s2021_s7] sm:$0xff]  ;;  %v269_v11 = vld [vmem:[%s2020_s6 + $0x10] sm:$0xff] }
  0x28   :  { %1383 = vmatpush3.msra.mxu0 %v98_v2  ;;  %v270_v12 = vld [vmem:[%s2020_s6 + $0x18] sm:$0xff]  ;;  %1402 = vmatprep.mubr.msk.f32.mxu1 %vm1661_vm1, %v1660_v17  ;;  %v377_v18 = vld [vmem:[%s2022_s8] sm:$0xff] }
  0x29   :  { %114 = vxpose.xlu0.b32.cont [2/4] (short) (narrow) %v110_v3, 32  ;;  %1384 = vmatprep.subr.mxu0 %v97_v4  ;;  %v495_v20 = vld [vmem:[%s2023_s9] sm:$0xff] }
  0x2a   :  { %1385 = vmatpush3.msra.mxu0 %v97_v4  ;;  %v623_v21 = vld [vmem:[%s2025_s11] sm:$0xff] }
  0x2b   :  { %1386 = vmatprep.subr.mxu0 %v96_v5  ;;  %272 = vxpose.xlu1.b32.cont [2/4] (short) (narrow) %v268_v9, 8  ;;  %v670_v22 = vld [vmem:[%s2027_s13] sm:$0xff] }
  0x2c   :  { %1387 = vmatpush3.msra.mxu0 %v96_v5  ;;  %v638_v23 = vld [vmem:[%s2026_s12] sm:$0xff] }
  0x2d   :  { %115 = vxpose.xlu0.b32.cont [3/4] (short) (narrow) %v111_v6, 32  ;;  %1410 = vmatprep.subr.mxu0 %v1660_v17  ;;  %v100_v49 = vld [vmem:[%s2016_s2] sm:$0xff]  ;;  %s93_s2 = sld [smem:[#allocation2]] }
  0x2e   :  { %v496_v51 = vld [vmem:[%s2024_s10] sm:$0xff]  ;;  %s1299_s10 = sld [smem:[#allocation2 + $0x1]] }
  0x2f   :  { %273 = vxpose.xlu1.b32.cont [3/4] (short) (narrow) %v269_v11, 8 }
  0x31   :  { %116 = vxpose.xlu0.b32.end [4/4] (short) (narrow) %v112_v7, 32 }
  0x33   :  { %274 = vxpose.xlu1.b32.end [4/4] (short) (narrow) %v270_v12, 8 }
  0x35   :  { %383 = vxpose.xlu0.b32.start.end [1/1] (short) (narrow) %v376_v10, 8 }
  0x39   :  { %502 = vxpose.xlu0.b32.start.end [1/1] (short) (narrow) %v495_v20, 8  ;;  %v618_v20 = vstv %s1299_s10 }
  0x51   :  { %1495 = vset.pattern.permute.xlu1 %v1662_v19 }
  0x52   :  { %380 = vperm.xlu1 %1495, %v377_v18  }
  0x56   :  { %626 = vperm.xlu1 %1495, %v623_v21  }
  0x5a   :  { %673 = vperm.xlu1 %1495, %v670_v22  }
  0x5e   :  { %641 = vperm.xlu1 %1495, %v638_v23  }
  0x62   :  { %1496 = vset.pattern.permute.xlu0 %v1662_v19 }
  0x63   :  { %499 = vperm.xlu0 %1496, %v496_v51  }
  0xa1   :  { %v129_v13 = vpop.trf.xlu0 }
  0xa2   :  { %1388 = vmatprep.mubr.msk.f32.mxu0 %vm145_vm0, %v129_v13  ;;  %v616_v13 = vstv %s93_s2 }
  0xa3   :  { %v287_v47 = vpop.trf.xlu1 }
  0xa5   :  { %v130_v14 = vpop.trf.xlu0 }
  0xa6   :  { %1389 = vmatmul.mubr.msk.f32.vlgmr.msra.gmra.mxu0 %vm145_vm0, %v130_v14 }
  0xa9   :  { %v131_v15 = vpop.trf.xlu0 }
  0xaa   :  { %1391 = vmatprep.mubr.msk.f32.mxu0 %vm145_vm0, %v131_v15 }
  0xad   :  { %v132_v16 = vpop.trf.xlu0 }
  0xae   :  { %1392 = vmatmul.mubr.msk.f32.gmra.mxu0 %vm145_vm0, %v132_v16 }
  0xaf   :  { %1412 = vmatprep.mubr.msk.f32.mxu0 %vm1661_vm1, %v1660_v17 }
  0xb1   :  { %v399_v50 = vpop.trf.xlu0 }
  0xb5   :  { %v518_v62 = vpop.trf.xlu0 }
  0xcd   :  { %v381_v54 = vpop.permute.xlu1 %380 }
  0xd1   :  { %v627_v2 = vpop.permute.xlu1 %626 }
  0xd5   :  { %v674_v7 = vpop.permute.xlu1 %673 }
  0xd9   :  { %v642_v9 = vpop.permute.xlu1 %641 }
  0xde   :  { %v500_v0 = vpop.permute.xlu0 %499 }
 0x166   :  { %v1390_v24 = vpop.f32.mrf.mxu0 }
 0x167   :  { %v248_v26 = vmin.f32 %v1390_v24, 0.0  ;;  %vm244_vm4 = vcmp.gt.f32.partialorder %v1390_v24, 0.0 }
 0x168   :  { %v224_v25 = vpop.f32.mrf.mxu0 }
 0x169   :  { %v247_v27 = vmin.f32 %v224_v25, 0.0  ;;  %v253_v28 = vmul.f32 1.442695, %v248_v26  ;;  %vm243_vm5 = vcmp.gt.f32.partialorder %v224_v25, 0.0 }
 0x16b   :  { %v251_v31 = vmul.f32 1.442695, %v247_v27  ;;  %1501 = vpow2.f32 %v253_v28 }
 0x16e   :  { %v1393_v29 = vpop.f32.mrf.mxu0 }
 0x16f   :  { %v250_v30 = vmin.f32 %v1393_v29, 0.0  ;;  %vm246_vm2 = vcmp.gt.f32.partialorder %v1393_v29, 0.0 }
 0x170   :  { %v234_v32 = vpop.f32.mrf.mxu0 }
 0x171   :  { %v257_v33 = vmul.f32 1.442695, %v250_v30  ;;  %v249_v34 = vmin.f32 %v234_v32, 0.0  ;;  %vm245_vm3 = vcmp.gt.f32.partialorder %v234_v32, 0.0 }
 0x173   :  { %1503 = vpow2.f32 %v257_v33  ;;  %v255_v35 = vmul.f32 1.442695, %v249_v34 }
 0x174   :  { %1505 = vpow2.f32 %v251_v31 }
 0x175   :  { %1507 = vpow2.f32 %v255_v35 }
 0x178   :  { %v1502_v36 = vpop.eup %1501 }
 0x179   :  { %v1306_v43 = vadd.f32 -1.0, %v1502_v36 }
 0x17b   :  { %v264_v46 = vsel %vm244_vm4, %v1390_v24, %v1306_v43 }
 0x180   :  { %v1504_v37 = vpop.eup %1503 }
 0x181   :  { %v1506_v38 = vpop.eup %1505  ;;  %v1308_v39 = vadd.f32 -1.0, %v1504_v37  ;;  %v662_v37 = vlaneseq }
 0x182   :  { %v1508_v40 = vpop.eup %1507  ;;  %v1305_v45 = vadd.f32 -1.0, %v1506_v38 }
 0x183   :  { %v266_v41 = vsel %vm246_vm2, %v1393_v29, %v1308_v39  ;;  %v1307_v42 = vadd.f32 -1.0, %v1508_v40 }
 0x184   :  { %1395 = vmatpush3.msra.mxu1 %v266_v41  ;;  %v263_v48 = vsel %vm243_vm5, %v224_v25, %v1305_v45 }
 0x185   :  { %1396 = vmatprep.subr.mxu1 %v1660_v17  ;;  %v265_v44 = vsel %vm245_vm3, %v234_v32, %v1307_v42  ;;  %v663_v42 = vshrl.u32 %v662_v37, 7 }
 0x186   :  { %1397 = vmatpush3.msra.mxu1 %v265_v44 }
 0x187   :  { %1398 = vmatprep.subr.mxu1 %v1660_v17  ;;  %vm665_vm11 = vcmp.eq.s32.totalorder %v663_v42, 1  ;;  %vm664_vm12 = vcmp.eq.s32.totalorder %v663_v42, 0 }
 0x188   :  { %1399 = vmatpush3.msra.mxu1 %v264_v46 }
 0x189   :  { %1400 = vmatprep.subr.mxu1 %v1660_v17 }
 0x18a   :  { %1401 = vmatpush3.msra.mxu1 %v263_v48 }
 0x18b   :  { %1403 = vmatmul.mubr.msk.f32.vlgmr.msra.gmra.mxu1 %vm145_vm0, %v287_v47  ;;  %1405 = vmatprep.subr.mxu1 %v1660_v17 }
 0x18c   :  { %1406 = vmatpush3.msra.mxu1 %v100_v49  ;;  %1407 = vmatprep.mubr.msk.f32.mxu1 %vm1661_vm1, %v1660_v17 }
 0x18f   :  { %1408 = vmatmul.mubr.msk.f32.vlgmr.msra.gmra.mxu1 %vm415_vm6, %v399_v50  ;;  %v666_v50 = vsel %vm665_vm11, 1.0, %v1660_v17 }
 0x24b   :  { %v1822_v52 = vpop.f32.mrf.mxu1 }
 0x24c   :  { %v614_v8 = vmul.f32 0.2, %v1822_v52  ;;  %vm613_vm8 = vcmp.gt.f32.partialorder %v1822_v52, 0.0  ;;  %v617_v21 = vmul.f32 %v616_v13, %v1822_v52 }
 0x24d   :  { %v1404_v53 = vpop.f32.mrf.mxu1 }
 0x24e   :  { %v615_v10 = vsel %vm613_vm8, %v1822_v52, %v614_v8  ;;  %v620_v27 = vmul.f32 %v617_v21, %v617_v21 }
 0x24f   :  { %v485_v55 = vpop.f32.mrf.mxu1  ;;  %v629_v11 = vmul.f32 %v627_v2, %v615_v10  ;;  %v644_v12 = vmul.f32 %v642_v9, %v615_v10 }
 0x250   :  { %v486_v56 = vadd.f32 %v485_v55, %v381_v54 }
 0x251   :  { %v1409_v57 = vpop.f32.mrf.mxu1  ;;  %v631_v15 = vsel %vm630_vm9, %v629_v11, 0.0  ;;  %v645_v16 = vsel %vm630_vm9, %v644_v12, 0.0 }
 0x252   :  { %v490_v58 = vmin.f32 %v486_v56, 0.0  ;;  %vm489_vm7 = vcmp.gt.f32.partialorder %v486_v56, 0.0  ;;  %v632_v22 = vrot.slane %v631_v15, 4  ;;  %v646_v23 = vrot.slane %v645_v16, 4 }
 0x254   :  { %v491_v59 = vmul.f32 1.442695, %v490_v58  ;;  %v633_v29 = vadd.f32 %v632_v22, %v631_v15  ;;  %v647_v30 = vadd.f32 %v646_v23, %v645_v16  ;;  %v1876_v15 = vld [vmem:[%s2017_s3 + $0x8] sm:$0xf] }
 0x256   :  { %1509 = vpow2.f32 %v491_v59  ;;  %v634_v33 = vrot.slane %v633_v29, 2  ;;  %v648_v34 = vrot.slane %v647_v30, 2 }
 0x258   :  { %v635_v38 = vadd.f32 %v634_v33, %v633_v29  ;;  %v649_v39 = vadd.f32 %v648_v34, %v647_v30  ;;  %v1894_v34 = vld [vmem:[%s2017_s3 + $0x10] sm:$0xf] }
 0x259   :  { %vm842_vm5 = vcmp.gt.bf16.partialorder %v1894_v34, 0 }
 0x25a   :  { %v636_v43 = vrot.slane %v635_v38, 1  ;;  %v650_v44 = vrot.slane %v649_v39, 1 }
 0x25c   :  { %v637_v47 = vadd.f32 %v636_v43, %v635_v38  ;;  %v651_v49 = vadd.f32 %v650_v44, %v649_v39 }
 0x263   :  { %v1510_v60 = vpop.eup %1509 }
 0x264   :  { %v1311_v61 = vadd.f32 -1.0, %v1510_v60 }
 0x266   :  { %v494_v63 = vsel %vm489_vm7, %v486_v56, %v1311_v61 }
 0x267   :  { %1411 = vmatpush3.msra.mxu0 %v494_v63 }
 0x268   :  { %1413 = vmatmul.mubr.msk.f32.vlgmr.msra.gmra.mxu0 %vm415_vm6, %v518_v62  ;;  %1435 = vmatprep.subr.bf16.mxu0 %v1660_v17 }
 0x269   :  { %1443 = vmatprep.mubr.msk.bf16.mxu0 %vm1661_vm1, %v1660_v17 }
 0x328   :  { %v603_v1 = vpop.f32.mrf.mxu0 }
 0x329   :  { %v604_v3 = vadd.f32 %v603_v1, %v500_v0 }
 0x32a   :  { %v1414_v4 = vpop.f32.mrf.mxu0 }
 0x32b   :  { %v608_v5 = vmin.f32 %v604_v3, 0.0  ;;  %vm607_vm10 = vcmp.gt.f32.partialorder %v604_v3, 0.0 }
 0x32d   :  { %v609_v6 = vmul.f32 1.442695, %v608_v5  ;;  %v1856_v5 = vld [vmem:[%s2017_s3 + $0x4] sm:$0xf] }
 0x32e   :  { %vm839_vm13 = vcmp.gt.bf16.partialorder %v1856_v5, 0 }
 0x32f   :  { %1511 = vpow2.f32 %v609_v6  ;;  %v1862_v6 = vld [vmem:[%s2017_s3] sm:$0xf]  ;;  %v871_v9 = vsel %vm839_vm13, 65537, %v1662_v19 }
 0x330   :  { %vm838_vm14 = vcmp.gt.bf16.partialorder %v1862_v6, 0  ;;  %v879_v13 = vunpack.c.l.b16 %v871_v9 }
 0x331   :  { %v870_v12 = vsel %vm838_vm14, 65537, %v1662_v19 }
 0x332   :  { %v878_v16 = vunpack.c.l.b16 %v870_v12  ;;  %vm887_vm2 = vcmp.ne.s32.totalorder %v879_v13, 0 }
 0x334   :  { %vm886_vm3 = vcmp.ne.s32.totalorder %v878_v16, 0 }
 0x33c   :  { %v1512_v14 = vpop.eup %1511 }
 0x33d   :  { %v1313_v18 = vadd.f32 -1.0, %v1512_v14  ;;  %v1870_v14 = vld [vmem:[%s2017_s3 + $0xc] sm:$0xf] }
 0x33e   :  { %vm841_vm15 = vcmp.gt.bf16.partialorder %v1870_v14, 0 }
 0x33f   :  { %v1834_v24 = vsel %vm607_vm10, %v604_v3, %v1313_v18  ;;  %v873_v22 = vsel %vm841_vm15, 65537, %v1662_v19 }
 0x340   :  { %v676_v25 = vmul.f32 %v674_v7, %v1834_v24  ;;  %v619_v26 = vmul.f32 %v618_v20, %v1834_v24 }
 0x342   :  { %677 = vxpose.xlu1.b32.start [1/4] (short) (narrow) %v676_v25, 64  ;;  %v621_v28 = vmul.f32 %v619_v26, %v619_v26 }
 0x344   :  { %v622_v31 = vadd.f32 %v621_v28, %v620_v27 }
 0x346   :  { %678 = vxpose.xlu1.b32.cont [2/4] (short) (narrow) %v617_v21, 64  ;;  %v652_v32 = vsel %vm630_vm9, %v622_v31, 0.0  ;;  %v881_v31 = vunpack.c.l.b16 %v873_v22 }
 0x347   :  { %v653_v35 = vrot.slane %v652_v32, 4 }
 0x348   :  { %vm889_vm6 = vcmp.ne.s32.totalorder %v881_v31, 0 }
 0x349   :  { %v654_v36 = vadd.f32 %v653_v35, %v652_v32  ;;  %v1886_v32 = vld [vmem:[%s2017_s3 + $0x14] sm:$0xf] }
 0x34a   :  { %679 = vxpose.xlu1.b32.cont [3/4] (short) (narrow) %v619_v26, 64  ;;  %vm843_vm4 = vcmp.gt.bf16.partialorder %v1886_v32, 0 }
 0x34b   :  { %v655_v40 = vrot.slane %v654_v36, 2  ;;  %v875_v43 = vsel %vm843_vm4, 65537, %v1662_v19 }
 0x34d   :  { %v656_v41 = vadd.f32 %v655_v40, %v654_v36 }
 0x34f   :  { %v657_v45 = vrot.slane %v656_v41, 1 }
 0x351   :  { %v658_v46 = vadd.f32 %v657_v45, %v656_v41 }
 0x353   :  { %v659_v48 = vmul.f32 0.5, %v658_v46  ;;  %v874_v46 = vsel %vm842_vm5, 65537, %v1662_v19 }
 0x355   :  { %v660_v51 = vsub.f32 %v637_v47, %v659_v48  ;;  %v661_v53 = vsub.f32 %v651_v49, %v659_v48 }
 0x357   :  { %v667_v54 = vsel %vm664_vm12, %v660_v51, %v666_v50  ;;  %v668_v55 = vsel %vm665_vm11, %v661_v53, 0.0  ;;  %v883_v51 = vunpack.c.l.b16 %v875_v43  ;;  %v1916_v53 = vld [vmem:[%s2017_s3 + $0x1c] sm:$0xf] }
 0x358   :  { %680 = vxpose.xlu1.b32.end [4/4] (short) (narrow) %v667_v54, 64  ;;  %v669_v56 = vsel %vm664_vm12, 1.0, %v668_v55  ;;  %v882_v55 = vunpack.c.l.b16 %v874_v46  ;;  %vm845_vm8 = vcmp.gt.bf16.partialorder %v1916_v53, 0 }
 0x359   :  { %1415 = vmatprep.subr.mxu1 %v669_v56  ;;  %vm891_vm10 = vcmp.ne.s32.totalorder %v883_v51, 0 }
 0x35a   :  { %1416 = vmatpush3.msra.mxu1 %v669_v56  ;;  %vm890_vm12 = vcmp.ne.s32.totalorder %v882_v55, 0 }
 0x35b   :  { %1417 = vmatprep.subr.mxu1 %v619_v26 }
 0x35c   :  { %1418 = vmatpush3.msra.mxu1 %v619_v26 }
 0x35d   :  { %1419 = vmatprep.subr.mxu1 %v617_v21 }
 0x35e   :  { %1420 = vmatpush3.msra.mxu1 %v617_v21 }
 0x35f   :  { %1421 = vmatprep.subr.mxu1 %v1834_v24 }
 0x360   :  { %1422 = vmatpush3.msra.mxu1 %v1834_v24 }
 0x361   :  { %1447 = vmatprep.subr.bf16.mxu1 %v1660_v17 }
 0x3c8   :  { %v693_v57 = vpop.trf.xlu1 }
 0x3c9   :  { %1423 = vmatprep.mubr.msk.f32.mxu1 %vm145_vm0, %v693_v57  ;;  %v1926_v57 = vld [vmem:[%s2017_s3 + $0x18] sm:$0xf]  ;;  %s1663_s3 = smov [#allocation10]  }
 0x3ca   :  { %vm844_vm11 = vcmp.gt.bf16.partialorder %v1926_v57, 0  ;;  %s1284_s19 = sshll.u32 %s1663_s3, 4  ;;  %s1285_s19 = int_to_ptr.vmem [resolvable:$true] %s1284_s19 }
 0x3cb   :  { %s1603_s20 = scalar_lea.vmem %s1285_s19, 16  ;;  %s1607_s21 = scalar_lea.vmem %s1285_s19, 32 }
 0x3cc   :  { %v694_v58 = vpop.trf.xlu1  ;;  %p1604_p10 = scmp.ne.s32.totalorder %s1285_s19, %s1603_s20  ;;  %p1608_p11 = scmp.lt.s32.totalorder %s1285_s19, %s1285_s19 }
 0x3cd   :  { %1424 = vmatmul.mubr.msk.f32.vlgmr.msra.gmra.mxu1 %vm145_vm0, %v694_v58  ;;  %p1609_p12 = scmp.lt.s32.totalorder %s1607_s21, %s1603_s20 }
 0x3cf   :  { %p1610_p13 = por %p1609_p12, %p1608_p11 }
 0x3d0   :  { %v695_v59 = vpop.trf.xlu1 }
 0x3d1   :  { %1426 = vmatprep.mubr.msk.f32.mxu1 %vm145_vm0, %v695_v59  ;;  %p1611_p0 = pnand %p1610_p13, %p1604_p10 }
 0x3d4   :  { %v696_v60 = vpop.trf.xlu1 }
 0x3d5   :  { %1427 = vmatmul.mubr.msk.f32.gmra.mxu1 %vm145_vm0, %v696_v60 }
 0x3d8   :  { %v697_v61 = vpop.trf.xlu1 }
 0x3d9   :  { %1429 = vmatprep.mubr.msk.f32.mxu1 %vm145_vm0, %v697_v61  ;;  %v877_v61 = vsel %vm845_vm8, 65537, %v1662_v19 }
 0x3dc   :  { %v698_v62 = vpop.trf.xlu1 }
 0x3dd   :  { %1430 = vmatmul.mubr.msk.f32.gmra.mxu1 %vm145_vm0, %v698_v62 }
 0x3e0   :  { %v699_v63 = vpop.trf.xlu1 }
 0x3e1   :  { %1432 = vmatprep.mubr.msk.f32.mxu1 %vm145_vm0, %v699_v63 }
 0x3e4   :  { %v700_v0 = vpop.trf.xlu1 }
 0x3e5   :  { %1433 = vmatmul.mubr.msk.f32.gmra.mxu1 %vm145_vm0, %v700_v0  ;;  %vm840_vm0 = vcmp.gt.bf16.partialorder %v1876_v15, 0 }
 0x3e6   :  { %1455 = vmatprep.mubr.msk.bf16.mxu1 %vm1661_vm1, %v1660_v17  ;;  %v872_v27 = vsel %vm840_vm0, 65537, %v1662_v19 }
 0x3e7   :  { %v880_v35 = vunpack.c.l.b16 %v872_v27 }
 0x3e9   :  { %vm888_vm7 = vcmp.ne.s32.totalorder %v880_v35, 0 }
 0x48d   :  { %v1425_v1 = vpop.f32.mrf.mxu1 }
 0x48e   :  { %v848_v2 = vmul.f32 1.442695, %v1425_v1 }
 0x48f   :  { %v799_v3 = vpop.f32.mrf.mxu1 }
 0x490   :  { %1513 = vpow2.f32 %v848_v2  ;;  %v846_v4 = vmul.f32 1.442695, %v799_v3  ;;  %v876_v2 = vsel %vm844_vm11, 65537, %v1662_v19 }
 0x491   :  { %v884_v9 = vunpack.c.l.b16 %v876_v2 }
 0x492   :  { %1515 = vpow2.f32 %v846_v4  ;;  %v885_v4 = vunpack.c.l.b16 %v877_v61 }
 0x493   :  { %vm892_vm14 = vcmp.ne.s32.totalorder %v884_v9, 0 }
 0x494   :  { %vm893_vm13 = vcmp.ne.s32.totalorder %v885_v4, 0 }
 0x495   :  { %v1428_v7 = vpop.f32.mrf.mxu1 }
 0x496   :  { %v852_v8 = vmul.f32 1.442695, %v1428_v7 }
 0x497   :  { %v809_v10 = vpop.f32.mrf.mxu1 }
 0x498   :  { %1517 = vpow2.f32 %v852_v8  ;;  %v850_v11 = vmul.f32 1.442695, %v809_v10 }
 0x49a   :  { %1519 = vpow2.f32 %v850_v11 }
 0x49d   :  { %v1514_v18 = vpop.eup %1513  ;;  %v1431_v20 = vpop.f32.mrf.mxu1 }
 0x49e   :  { %v856_v21 = vmul.f32 1.442695, %v1431_v20  ;;  %v863_v23 = vadd.f32 1e-09, %v1514_v18 }
 0x49f   :  { %v1516_v25 = vpop.eup %1515  ;;  %v819_v26 = vpop.f32.mrf.mxu1 }
 0x4a0   :  { %1521 = vpow2.f32 %v856_v21  ;;  %v854_v28 = vmul.f32 1.442695, %v819_v26  ;;  %v862_v29 = vadd.f32 1e-09, %v1516_v25  ;;  %v1881_v30 = vsel %vm887_vm2, %v863_v23, 0.0 }
 0x4a1   :  { %v1902_v37 = vsel %vm630_vm9, %v1881_v30, 0.0 }
 0x4a2   :  { %1523 = vpow2.f32 %v854_v28  ;;  %v1888_v33 = vsel %vm886_vm3, %v862_v29, 0.0 }
 0x4a3   :  { %v1898_v36 = vsel %vm630_vm9, %v1888_v33, 0.0 }
 0x4a4   :  { %v926_v38 = vadd.f32 %v1902_v37, %v1898_v36 }
 0x4a5   :  { %v1518_v39 = vpop.eup %1517  ;;  %v1434_v40 = vpop.f32.mrf.mxu1 }
 0x4a6   :  { %v860_v41 = vmul.f32 1.442695, %v1434_v40  ;;  %v865_v42 = vadd.f32 1e-09, %v1518_v39 }
 0x4a7   :  { %v1520_v44 = vpop.eup %1519  ;;  %v829_v45 = vpop.f32.mrf.mxu1 }
 0x4a8   :  { %1525 = vpow2.f32 %v860_v41  ;;  %v858_v47 = vmul.f32 1.442695, %v829_v45  ;;  %v1909_v48 = vsel %vm889_vm6, %v865_v42, 0.0  ;;  %v864_v49 = vadd.f32 1e-09, %v1520_v44 }
 0x4a9   :  { %v911_v50 = vsel %vm630_vm9, %v1909_v48, 0.0 }
 0x4aa   :  { %1527 = vpow2.f32 %v858_v47  ;;  %912 = vadd.xlane.f32.xlu1 %v911_v50  ;;  %v1918_v54 = vsel %vm888_vm7, %v864_v49, 0.0 }
 0x4ab   :  { %v908_v56 = vsel %vm630_vm9, %v1918_v54, 0.0 }
 0x4ac   :  { %v927_v58 = vadd.f32 %v926_v38, %v908_v56 }
 0x4ad   :  { %v1522_v59 = vpop.eup %1521 }
 0x4ae   :  { %v867_v60 = vadd.f32 1e-09, %v1522_v59  ;;  %v928_v62 = vadd.f32 %v927_v58, %v911_v50 }
 0x4af   :  { %v1524_v63 = vpop.eup %1523 }
 0x4b0   :  { %v1930_v0 = vsel %vm891_vm10, %v867_v60, 0.0  ;;  %v866_v1 = vadd.f32 1e-09, %v1524_v63 }
 0x4b1   :  { %v917_v3 = vsel %vm630_vm9, %v1930_v0, 0.0 }
 0x4b2   :  { %918 = vadd.xlane.f32.xlu0 %v917_v3  ;;  %v898_v7 = vsel %vm890_vm12, %v866_v1, 0.0 }
 0x4b3   :  { %v914_v8 = vsel %vm630_vm9, %v898_v7, 0.0 }
 0x4b4   :  { %v929_v10 = vadd.f32 %v928_v62, %v914_v8 }
 0x4b5   :  { %v1526_v11 = vpop.eup %1525 }
 0x4b6   :  { %915 = vadd.xlane.f32.xlu0 %v914_v8  ;;  %v869_v12 = vadd.f32 1e-09, %v1526_v11  ;;  %v930_v13 = vadd.f32 %v929_v10, %v917_v3 }
 0x4b7   :  { %v1528_v16 = vpop.eup %1527 }
 0x4b8   :  { %v901_v18 = vsel %vm893_vm13, %v869_v12, 0.0  ;;  %v868_v20 = vadd.f32 1e-09, %v1528_v16 }
 0x4b9   :  { %v923_v19 = vsel %vm630_vm9, %v901_v18, 0.0 }
 0x4ba   :  { %924 = vadd.xlane.f32.xlu0 %v923_v19  ;;  %v900_v21 = vsel %vm892_vm14, %v868_v20, 0.0  ;;  %v1968_v20 = vmul.f32 0.1, %v1822_v52 }
 0x4bb   :  { %v920_v22 = vsel %vm630_vm9, %v900_v21, 0.0 }
 0x4bc   :  { %v931_v23 = vadd.f32 %v930_v13, %v920_v22 }
 0x4be   :  { %921 = vadd.xlane.f32.xlu0 %v920_v22  ;;  %v1938_v25 = vadd.f32 %v931_v23, %v923_v19 }
 0x4c2   :  { %909 = vadd.xlane.f32.xlu0 %v908_v56 }
 0x4c6   :  { %903 = vadd.xlane.f32.xlu0 %v1898_v36 }
 0x4ca   :  { %906 = vadd.xlane.f32.xlu0 %v1902_v37 }
 0x533   :  { %v913_v31 = vpop.xlane.xlu1 %912 }
 0x534   :  { %vm942_vm5 = vcmp.gt.f32.partialorder %v913_v31, 0.0 }
 0x53b   :  { %v919_v26 = vpop.xlane.xlu0 %918 }
 0x53c   :  { %vm944_vm3 = vcmp.gt.f32.partialorder %v919_v26, 0.0 }
 0x53f   :  { %v916_v27 = vpop.xlane.xlu0 %915 }
 0x540   :  { %vm943_vm0 = vcmp.gt.f32.partialorder %v916_v27, 0.0 }
 0x543   :  { %v925_v28 = vpop.xlane.xlu0 %924 }
 0x544   :  { %1529 = vrsqrt.f32 %v925_v28  ;;  %vm946_vm15 = vcmp.gt.f32.partialorder %v925_v28, 0.0  ;;  %v1498_v28 = vld [vmem:[#allocation6 + $0x10] sm:$0xff]  }
 0x545   :  { %1531 = vrsqrt.f32 %v916_v27 }
 0x546   :  { %1533 = vrsqrt.f32 %v919_v26 }
 0x547   :  { %v922_v29 = vpop.xlane.xlu0 %921 }
 0x548   :  { %1535 = vrsqrt.f32 %v922_v29  ;;  %vm945_vm2 = vcmp.gt.f32.partialorder %v922_v29, 0.0  ;;  %v1499_v29 = vld [vmem:[#allocation6 + $0x8] sm:$0xff]  }
 0x549   :  { %1537 = vrsqrt.f32 %v913_v31  ;;  %v1500_v31 = vld [vmem:[#allocation6] sm:$0xff]  }
 0x54b   :  { %v910_v35 = vpop.xlane.xlu0 %909 }
 0x54c   :  { %1539 = vrsqrt.f32 %v910_v35  ;;  %vm941_vm4 = vcmp.gt.f32.partialorder %v910_v35, 0.0  ;;  %v1180_v35 = vpack.c.bf16 %v1834_v24, %v1834_v24 }
 0x54f   :  { %v904_v38 = vpop.xlane.xlu0 %903 }
 0x550   :  { %1541 = vrsqrt.f32 %v904_v38  ;;  %vm939_vm6 = vcmp.gt.f32.partialorder %v904_v38, 0.0 }
 0x551   :  { %v1530_v39 = vpop.eup %1529 }
 0x552   :  { %v1532_v40 = vpop.eup %1531  ;;  %v962_v37 = vsel %vm946_vm15, %v1530_v39, 0.0 }
 0x553   :  { %v907_v36 = vpop.xlane.xlu0 %906  ;;  %v1534_v41 = vpop.eup %1533  ;;  %v959_v43 = vsel %vm943_vm0, %v1532_v40, 0.0  ;;  %v973_v45 = vmul.f32 %v962_v37, %v901_v18 }
 0x554   :  { %1543 = vrsqrt.f32 %v907_v36  ;;  %v960_v49 = vsel %vm944_vm3, %v1534_v41, 0.0  ;;  %v970_v51 = vmul.f32 %v959_v43, %v898_v7  ;;  %vm940_vm7 = vcmp.gt.f32.partialorder %v907_v36, 0.0 }
 0x555   :  { %v1536_v42 = vpop.eup %1535  ;;  %v971_v58 = vmul.f32 %v960_v49, %v1930_v0  ;;  %v978_v49 = vunpack.c.l.bf16 %v1862_v6  ;;  %v983_v6 = vunpack.c.l.bf16 %v1886_v32 }
 0x556   :  { %v961_v44 = vsel %vm945_vm2, %v1536_v42, 0.0  ;;  %v1538_v47 = vpop.eup %1537 }
 0x557   :  { %v972_v46 = vmul.f32 %v961_v44, %v900_v21  ;;  %v958_v59 = vsel %vm942_vm5, %v1538_v47, 0.0  ;;  %v976_v61 = vpack.c.bf16 %v971_v58, %v970_v51  ;;  %v980_v51 = vunpack.c.l.bf16 %v1876_v15 }
 0x558   :  { %v969_v63 = vmul.f32 %v958_v59, %v1909_v48  ;;  %v981_v59 = vunpack.c.l.bf16 %v1870_v14  ;;  %v985_v14 = vunpack.c.l.bf16 %v1916_v53 }
 0x559   :  { %v1540_v50 = vpop.eup %1539  ;;  %v977_v55 = vpack.c.bf16 %v973_v45, %v972_v46 }
 0x55a   :  { %v957_v56 = vsel %vm941_vm4, %v1540_v50, 0.0  ;;  %v979_v50 = vunpack.c.l.bf16 %v1856_v5 }
 0x55b   :  { %1436 = vmatpush3.bf16.msra.mxu0 %v977_v55  ;;  %1448 = vmatpush3.bf16.msra.mxu1 %v977_v55  ;;  %v968_v62 = vmul.f32 %v957_v56, %v1918_v54  ;;  %v1015_v54 = vpack.c.bf16 %v1822_v52, %v1822_v52 }
 0x55c   :  { %1437 = vmatprep.subr.bf16.mxu0 %v1660_v17  ;;  %1449 = vmatprep.subr.bf16.mxu1 %v1660_v17  ;;  %v987_v56 = vsel %vm630_vm9, %v979_v50, 0.0 }
 0x55d   :  { %v1542_v60 = vpop.eup %1541  ;;  %v975_v2 = vpack.c.bf16 %v969_v63, %v968_v62  ;;  %v982_v62 = vunpack.c.l.bf16 %v1894_v34 }
 0x55e   :  { %v955_v1 = vsel %vm939_vm6, %v1542_v60, 0.0 }
 0x55f   :  { %1438 = vmatpush3.bf16.msra.mxu0 %v976_v61  ;;  %1450 = vmatpush3.bf16.msra.mxu1 %v976_v61  ;;  %v966_v4 = vmul.f32 %v955_v1, %v1888_v33  ;;  %v993_v5 = vsel %vm630_vm9, %v982_v62, 0.0  ;;  %v995_v1 = vsel %vm630_vm9, %v983_v6, 0.0 }
 0x560   :  { %1439 = vmatprep.subr.bf16.mxu0 %v1660_v17  ;;  %1451 = vmatprep.subr.bf16.mxu1 %v1660_v17 }
 0x561   :  { %v1544_v0 = vpop.eup %1543 }
 0x562   :  { %v956_v3 = vsel %vm940_vm7, %v1544_v0, 0.0  ;;  %v984_v0 = vunpack.c.l.bf16 %v1926_v57 }
 0x563   :  { %v967_v7 = vmul.f32 %v956_v3, %v1881_v30  ;;  %1440 = vmatpush3.bf16.msra.mxu0 %v975_v2  ;;  %1452 = vmatpush3.bf16.msra.mxu1 %v975_v2  ;;  %v933_v30 = vrot.slane %v1938_v25, 4 }
 0x564   :  { %1441 = vmatprep.subr.bf16.mxu0 %v1660_v17  ;;  %1453 = vmatprep.subr.bf16.mxu1 %v1660_v17  ;;  %v997_v3 = vsel %vm630_vm9, %v984_v0, 0.0 }
 0x565   :  { %v974_v48 = vpack.c.bf16 %v967_v7, %v966_v4  ;;  %v934_v33 = vadd.f32 %v933_v30, %v1938_v25  ;;  %v1497_v25 = vld [vmem:[#allocation6 + $0x18] sm:$0xff]   ;;  %v999_v7 = vsel %vm630_vm9, %v985_v14, 0.0 }
 0x567   :  { %1442 = vmatpush3.bf16.msra.mxu0 %v974_v48  ;;  %1454 = vmatpush3.bf16.msra.mxu1 %v974_v48  ;;  %v935_v8 = vrot.slane %v934_v33, 2 }
 0x568   :  { %1459 = vmatprep.subr.bf16.mxu0 %v1660_v17  ;;  %1471 = vmatprep.subr.bf16.mxu1 %v1660_v17 }
 0x569   :  { %v936_v9 = vadd.f32 %v935_v8, %v934_v33 }
 0x56a   :  { %1444 = vmatmul.mubr.msk.bf16.vlgmr.msra.gmra.mxu0 %vm630_vm9, %v1015_v54 }
 0x56b   :  { %1460 = vmatpush3.bf16.msra.mxu0 %v977_v55  ;;  %1467 = vmatprep.mubr.msk.bf16.mxu0 %vm1661_vm1, %v1660_v17  ;;  %v937_v10 = vrot.slane %v936_v9, 1  ;;  %v986_v55 = vsel %vm630_vm9, %v978_v49, 0.0 }
 0x56c   :  { %1461 = vmatprep.subr.bf16.mxu0 %v1660_v17  ;;  %v988_v58 = vadd.f32 %v987_v56, %v986_v55 }
 0x56d   :  { %v938_v11 = vadd.f32 %v937_v10, %v936_v9 }
 0x56f   :  { %1462 = vmatpush3.bf16.msra.mxu0 %v976_v61  ;;  %1545 = vrsqrt.f32 %v938_v11  ;;  %vm963_vm8 = vcmp.gt.f32.partialorder %v938_v11, 0.0  ;;  %v991_v61 = vsel %vm630_vm9, %v981_v59, 0.0 }
 0x570   :  { %1463 = vmatprep.subr.bf16.mxu0 %v1660_v17 }
 0x573   :  { %1464 = vmatpush3.bf16.msra.mxu0 %v975_v2 }
 0x574   :  { %1465 = vmatprep.subr.bf16.mxu0 %v1660_v17 }
 0x577   :  { %1466 = vmatpush3.bf16.msra.mxu0 %v974_v48 }
 0x57c   :  { %v1546_v12 = vpop.eup %1545 }
 0x57d   :  { %v965_v13 = vsel %vm963_vm8, %v1546_v12, 0.0 }
 0x57e   :  { %v1965_v16 = vmul.f32 0.9, %v965_v13 }
 0x62a   :  { %v1053_v18 = vpop.f32.mrf.mxu0 }
 0x62b   :  { %v1059_v19 = vmul.f32 %v1053_v18, %v1965_v16 }
 0x62c   :  { %v1445_v21 = vpop.f32.mrf.mxu0 }
 0x62d   :  { %v1060_v22 = vadd.f32 %v1059_v19, %v1968_v20 }
 0x62e   :  { %v1056_v23 = vpop.f32.mrf.mxu0 }
 0x62f   :  { %v1061_v26 = vpack.c.bf16 %v1060_v22, %v1060_v22 }
 0x630   :  { %v1446_v27 = vpop.f32.mrf.mxu0 }
 0x631   :  { %1456 = vmatmul.mubr.msk.bf16.vlgmr.msra.gmra.mxu1 %vm630_vm9, %v1061_v26 }
 0x632   :  { %1472 = vmatpush3.bf16.msra.mxu1 %v1497_v25  ;;  %1479 = vmatprep.mubr.msk.bf16.mxu1 %vm1661_vm1, %v1660_v17  ;;  %vm1266_vm1 = vcmask 0  }
 0x633   :  { %1473 = vmatprep.subr.bf16.mxu1 %v1660_v17 }
 0x636   :  { %1474 = vmatpush3.bf16.msra.mxu1 %v1498_v28 }
 0x637   :  { %1475 = vmatprep.subr.bf16.mxu1 %v1660_v17 }
 0x63a   :  { %1476 = vmatpush3.bf16.msra.mxu1 %v1499_v29 }
 0x63b   :  { %1477 = vmatprep.subr.bf16.mxu1 %v1660_v17 }
 0x63e   :  { %1478 = vmatpush3.bf16.msra.mxu1 %v1500_v31 }
 0x641   :  { %1480 = vmatmul.mubr.msk.bf16.vlgmr.msra.gmra.mxu1 %vm630_vm9, %v1180_v35 }
 0x6f1   :  { %v1099_v38 = vpop.f32.mrf.mxu1 }
 0x6f2   :  { %v1105_v39 = vmul.f32 %v1099_v38, %v1965_v16 }
 0x6f3   :  { %v1457_v40 = vpop.f32.mrf.mxu1 }
 0x6f4   :  { %v1106_v36 = vadd.f32 %v1105_v39, %v1968_v20 }
 0x6f5   :  { %v1102_v41 = vpop.f32.mrf.mxu1 }
 0x6f6   :  { %v1107_v37 = vpack.c.bf16 %v1106_v36, %v1106_v36 }
 0x6f7   :  { %v1458_v42 = vpop.f32.mrf.mxu1 }
 0x6f8   :  { %1468 = vmatmul.mubr.msk.bf16.vlgmr.msra.gmra.mxu0 %vm630_vm9, %v1107_v37 }
 0x701   :  { %v1250_v43 = vpop.f32.mrf.mxu1 }
 0x702   :  { %v1256_v17 = vmul.f32 %v1250_v43, %v1834_v24  ;;  %v989_v24 = vsel %vm630_vm9, %v980_v51, 0.0 }
 0x703   :  { %v1481_v44 = vpop.f32.mrf.mxu1  ;;  %v990_v60 = vadd.f32 %v989_v24, %v988_v58 }
 0x704   :  { %v1257_v45 = vsel %vm630_vm9, %v1256_v17, 0.0 }
 0x705   :  { %1258 = vadd.xlane.f32.xlu0 %v1257_v45  ;;  %v1253_v46 = vpop.f32.mrf.mxu1  ;;  %v992_v63 = vadd.f32 %v991_v61, %v990_v60 }
 0x707   :  { %v1482_v47 = vpop.f32.mrf.mxu1  ;;  %v994_v15 = vadd.f32 %v993_v5, %v992_v63 }
 0x709   :  { %v996_v2 = vadd.f32 %v995_v1, %v994_v15 }
 0x70b   :  { %v998_v4 = vadd.f32 %v997_v3, %v996_v2 }
 0x70d   :  { %v1000_v48 = vadd.f32 %v999_v7, %v998_v4 }
 0x70f   :  { %v1001_v34 = vrot.slane %v1000_v48, 4 }
 0x711   :  { %v1002_v54 = vadd.f32 %v1001_v34, %v1000_v48 }
 0x713   :  { %v1003_v30 = vrot.slane %v1002_v54, 2 }
 0x715   :  { %v1004_v8 = vadd.f32 %v1003_v30, %v1002_v54 }
 0x717   :  { %v1005_v12 = vrot.slane %v1004_v8, 1 }
 0x719   :  { %v1006_v53 = vadd.f32 %v1005_v12, %v1004_v8 }
 0x78e   :  { %v1259_v32 = vpop.xlane.xlu0 %1258 }
 0x78f   :  { %v1260_v33 = vrot.slane %v1259_v32, 4 }
 0x791   :  { %v1261_v9 = vadd.f32 %v1260_v33, %v1259_v32 }
 0x793   :  { %v1262_v10 = vrot.slane %v1261_v9, 2 }
 0x795   :  { %v1263_v11 = vadd.f32 %v1262_v10, %v1261_v9 }
 0x797   :  { %v1264_v57 = vrot.slane %v1263_v11, 1 }
 0x799   :  { %v1265_v13 = vadd.f32 %v1264_v57, %v1263_v11 }
 0x79b   :  { %1267 = vst.msk [vmem:[#allocation10] sm:$0x1] %vm1266_vm1, %v1265_v13 }
 0x79c   :  { %1614 = shalt.err (!%p1611_p0)
}
 0x79d   :  { %1287 = dma.vmem_to_hbm [thread:$0]  %s1285_s19, 16, %s2029_s15, [#allocation11]   ;;  %v1007_v18 = vadd.f32 1e-09, %v1006_v53 }
 0x79e   :  { %s1300_s22 = sld [smem:[#allocation2 + $0x2]]  ;;  %s1664_s15 = smov [#allocation9]  }
 0x79f   :  { %1547 = vrcp.f32 %v1007_v18  ;;  %s1274_s9 = sshll.u32 %s1664_s15, 4  ;;  %s1275_s9 = int_to_ptr.vmem [resolvable:$true] %s1274_s9 }
 0x7a0   :  { %s1623_s11 = scalar_lea.vmem %s1275_s9, 128  ;;  %p1628_p2 = scmp.lt.s32.totalorder %s1275_s9, %s1275_s9 }
 0x7a1   :  { %p1624_p1 = scmp.ne.s32.totalorder %s1275_s9, %s1623_s11  ;;  %p1629_p3 = scmp.lt.s32.totalorder %s1623_s11, %s1623_s11 }
 0x7a3   :  { %p1630_p4 = por %p1629_p3, %p1628_p2 }
 0x7a4   :  { %v1009_v21 = vstv %s1300_s22 }
 0x7a5   :  { %p1631_p5 = pnand %p1630_p4, %p1624_p1 }
 0x7ac   :  { %v1548_v19 = vpop.eup %1547 }
 0x7ad   :  { %v1010_v22 = vmul.f32 %v1548_v19, %v1009_v21 }
 0x7af   :  { %v1011_v23 = vmul.f32 %v1010_v22, %v1822_v52 }
 0x7b1   :  { %v1014_v26 = vadd.f32 %v1968_v20, %v1011_v23 }
 0x7b8   :  { %v1145_v25 = vpop.f32.mrf.mxu0 }
 0x7b9   :  { %v1151_v27 = vmul.f32 %v1145_v25, %v1965_v16 }
 0x7ba   :  { %v1469_v28 = vpop.f32.mrf.mxu0 }
 0x7bb   :  { %v1152_v29 = vadd.f32 %v1151_v27, %v1014_v26 }
 0x7bc   :  { %v1148_v31 = vpop.f32.mrf.mxu0 }
 0x7bd   :  { %v1154_v35 = vmin.f32 %v1152_v29, 0.0  ;;  %vm1153_vm10 = vcmp.gt.f32.partialorder %v1152_v29, 0.0 }
 0x7be   :  { %v1470_v38 = vpop.f32.mrf.mxu0 }
 0x7bf   :  { %v1155_v39 = vmul.f32 1.442695, %v1154_v35 }
 0x7c1   :  { %1549 = vpow2.f32 %v1155_v39 }
 0x7ce   :  { %v1550_v40 = vpop.eup %1549 }
 0x7cf   :  { %v1325_v36 = vadd.f32 -1.0, %v1550_v40 }
 0x7d1   :  { %v1158_v41 = vsel %vm1153_vm10, %v1152_v29, %v1325_v36 }
 0x7d2   :  { %v1159_v37 = vsel %vm630_vm9, %v1158_v41, -inf }
 0x7d3   :  { %v1160_v42 = vrot.slane %v1159_v37, 4 }
 0x7d5   :  { %v1161_v52 = vmax.f32 %v1159_v37, %v1160_v42 }
 0x7d7   :  { %v1162_v43 = vrot.slane %v1161_v52, 2 }
 0x7d9   :  { %v1163_v17 = vmax.f32 %v1161_v52, %v1162_v43 }
 0x7db   :  { %v1164_v20 = vrot.slane %v1163_v17, 1 }
 0x7dd   :  { %v1165_v44 = vmax.f32 %v1163_v17, %v1164_v20 }
 0x7df   :  { %v1166_v16 = vsub.f32 %v1158_v41, %v1165_v44 }
 0x7e1   :  { %v1167_v45 = vmul.f32 1.442695, %v1166_v16 }
 0x7e3   :  { %1551 = vpow2.f32 %v1167_v45 }
 0x7f0   :  { %v1552_v46 = vpop.eup %1551 }
 0x7f1   :  { %v1169_v47 = vsel %vm630_vm9, %v1552_v46, 0.0 }
 0x7f2   :  { %v1170_v49 = vrot.slane %v1169_v47, 4 }
 0x7f4   :  { %v1171_v50 = vadd.f32 %v1170_v49, %v1169_v47 }
 0x7f6   :  { %v1172_v51 = vrot.slane %v1171_v50, 2 }
 0x7f8   :  { %v1173_v55 = vadd.f32 %v1172_v51, %v1171_v50 }
 0x7fa   :  { %v1174_v56 = vrot.slane %v1173_v55, 1 }
 0x7fc   :  { %v1175_v58 = vadd.f32 %v1174_v56, %v1173_v55 }
 0x7fe   :  { %1553 = vlog2.f32 %v1175_v58 }
 0x80b   :  { %v1554_v59 = vpop.eup %1553 }
 0x80c   :  { %v1177_v24 = vmul.f32 0.6931472, %v1554_v59 }
 0x80e   :  { %v1178_v60 = vsub.f32 %v1166_v16, %v1177_v24 }
 0x810   :  { %1179 = vst.msk [vmem:[#allocation9] sm:$0xff] %vm630_vm9, %v1178_v60 }
 0x811   :  { %1634 = shalt.err (!%p1631_p5)
}
 0x812   :  { %1277 = dma.vmem_to_hbm [thread:$0]  %s1275_s9, 128, %s2028_s14, [#allocation4]  }
 0x813   :  { %1649 = dma.done.wait [#allocation4], 128  }
 0x814   :  { %1650 = vsyncadd [#allocation4], 4294967168 }
 0x815   :  { %1651 = dma.done.wait [#allocation11], 16  }
 0x816   :  { %1652 = vsyncadd [#allocation11], 4294967280 }
 0x817   :  { %1294 = vsyncpa [#allocation3], 1 }
 0x818   :  { %1295 = vsyncpa [#allocation8], 1 }
 0x819   :  { %1296 = vsyncpa [#allocation4], 1 }
 0x81a   :  { %1297 = vsyncpa [#allocation11], 1 }
 0x81b   :  { %1298 = vsyncpa [#allocation5], 1 }

</bundles_post_ra>
